<compile_context>
chip_gen: v7x
topology: tpu7x:2x2x1
jax: 0.10.0
libtpu: 0.0.40
codegen_flags: <defaults>
</compile_context>

<pallas_src>
import functools

import jax
import jax.numpy as jnp
from jax.experimental import pallas as pl
from jax.experimental.pallas import tpu as pltpu


_MAX_LANE_WIDTH = 1024          # preferred lane-dense last dim (multiple of 128)
_MAX_TILE_ROWS = 1024           # 1024 rows x 1024 lanes x 4B = 4 MiB / tile buffer
_VMEM_LIMIT_BYTES = 40 * 1024 * 1024   # headroom over ~16 MiB of double-buffers


def _quant_kernel(scale_ref, x_ref, o_ref, *, num_bits):
    # scale_ref: (1,) scalar-prefetch ref (SMEM); x_ref/o_ref: (tm, W) VMEM tiles.
    level_high = jnp.float32(2 ** (num_bits - 1) - 1)
    level_low = -(level_high + 1.0)
    s = level_high / scale_ref[0]                    # scalar, once per tile
    y = x_ref[...].astype(jnp.float32) * s
    y = jnp.clip(y, level_low, level_high)
    y = jnp.round(y)                                 # round-half-to-even == torch.round
    # True division (matches the PyTorch reference bit-for-bit); hidden under DMA.
    o_ref[...] = (y / s).astype(o_ref.dtype)


def _quant_jnp(x_flat, scale_scalar, num_bits):
    # Pure-JAX path, identical math, used only for non-128-aligned total sizes.
    level_high = jnp.float32(2 ** (num_bits - 1) - 1)
    level_low = -(level_high + 1.0)
    s = level_high / scale_scalar
    y = jnp.round(jnp.clip(x_flat.astype(jnp.float32) * s, level_low, level_high))
    return (y / s).astype(x_flat.dtype)


def _pick_lane_width(n):
    for w in (1024, 512, 256, 128):
        if n % w == 0:
            return w
    return None


def _pick_tile_rows(rows, max_rows=_MAX_TILE_ROWS):
    if rows <= max_rows:
        return rows                      # block rows == full dim (always legal)
    # tm < rows: must be a multiple of 8. Prefer a divisor of rows so the last
    # tile is full (no masked sublane stores, even split across TensorCores).
    start = max_rows - (max_rows % 8)
    for tm in range(start, 7, -8):
        if rows % tm == 0:
            return tm
    return start                         # partial last tile (masked) - still correct


def reference_quantize(x, scale, num_bits=8):
    """Symmetric fake-quantization forward, matching ReferenceQuantizeSymmetric.forward."""
    orig_shape = x.shape
    orig_dtype = x.dtype
    flat = x.reshape(-1)                 # metadata-only for contiguous input
    n = flat.shape[0]
    scale_s = jnp.asarray(scale, jnp.float32).reshape(1)

    W = _pick_lane_width(n)
    if W is None:
        # TODO(synk): total size not a multiple of 128 -- pure-JAX fallback avoids
        # the full-array concatenate a kernel+tail split would require.
        return _quant_jnp(flat, scale_s[0], num_bits).reshape(orig_shape)

    rows = n // W
    x2d = flat.reshape(rows, W)          # lane-dense view
    tm = _pick_tile_rows(rows)
    num_tiles = pl.cdiv(rows, tm)
    itemsize = jnp.dtype(orig_dtype).itemsize

    kernel = functools.partial(_quant_kernel, num_bits=num_bits)
    out2d = pl.pallas_call(
        kernel,
        out_shape=jax.ShapeDtypeStruct((rows, W), orig_dtype),
        grid_spec=pltpu.PrefetchScalarGridSpec(
            num_scalar_prefetch=1,       # scale lands in SMEM before the grid runs
            grid=(num_tiles,),
            in_specs=[pl.BlockSpec((tm, W), lambda i, s_ref: (i, 0))],
            out_specs=pl.BlockSpec((tm, W), lambda i, s_ref: (i, 0)),
        ),
        compiler_params=pltpu.CompilerParams(
            # TODO(synk): on v7x, evaluate pltpu.CORE_PARALLEL here and confirm in
            # xprof that both TensorCores issue DMAs (plain "parallel" may pin one TC).
            dimension_semantics=("parallel",),
            vmem_limit_bytes=_VMEM_LIMIT_BYTES,
        ),
        cost_estimate=pl.CostEstimate(
            flops=5 * n,
            transcendentals=0,
            bytes_accessed=2 * n * itemsize,
        ),
    )(scale_s, x2d)
    return out2d.reshape(orig_shape)


def reference_quantize_ref(x, scale, num_bits=8):
    """Pure-JAX reference (same math as the PyTorch module) for correctness checks."""
    level_high = jnp.float32(2 ** (num_bits - 1) - 1)
    level_low = -(level_high + 1.0)
    s = level_high / jnp.asarray(scale, jnp.float32).reshape(())
    y = jnp.clip(x.astype(jnp.float32) * s, level_low, level_high)
    return (jnp.round(y) / s).astype(x.dtype)


if __name__ == "__main__":
    key = jax.random.PRNGKey(0)
    k1, k2 = jax.random.split(key)

    # Small NCHW activation-like input, consistent with the module's usage.
    x = jax.random.normal(k1, (2, 4, 16, 16), dtype=jnp.float32)
    # nn.Parameter(torch.ones([1])) -> deterministic init of the scale parameter.
    scale = jnp.ones((1,), dtype=jnp.float32)

    out = reference_quantize(x, scale, num_bits=8)
    out = jax.block_until_ready(out)
    expected = reference_quantize_ref(x, scale, num_bits=8)
    assert out.shape == x.shape and out.dtype == x.dtype
    assert jnp.allclose(out, expected, rtol=1e-6, atol=1e-6), \
        "mismatch vs pure-JAX reference (main shape)"

    # Second small shape exercising the adaptive lane-width path (n % 1024 != 0).
    x2 = jax.random.normal(k2, (3, 5, 16, 16), dtype=jnp.float32)   # 3840 elems -> W=256
    out2 = jax.block_until_ready(reference_quantize(x2, scale, num_bits=8))
    expected2 = reference_quantize_ref(x2, scale, num_bits=8)
    assert out2.shape == x2.shape and out2.dtype == x2.dtype
    assert jnp.allclose(out2, expected2, rtol=1e-6, atol=1e-6), \
        "mismatch vs pure-JAX reference (ragged shape)"

    print("KERNEL_OK")
</pallas_src>

<mosaic_0001>
module attributes {stable_mosaic.version = 11 : i64} {
  func.func @_quant_kernel(%arg0: i32, %arg1: memref<1xf32, #tpu.memory_space<smem>>, %arg2: memref<2x1024xf32, #tpu.memory_space<vmem>>, %arg3: memref<2x1024xf32, #tpu.memory_space<vmem>>) attributes {dimension_semantics = [#tpu.dimension_semantics<parallel>], iteration_bounds = array<i64: 1>, scalar_prefetch = 1 : i64, scratch_operands = 0 : i64, tpu.core_type = #tpu.core_type<tc>, window_params = [{transform_indices = @transform_0, window_bounds = array<i64: 2, 1024>}, {transform_indices = @transform_1, window_bounds = array<i64: 2, 1024>}]} {
    %cst = arith.constant 1.270000e+02 : f32
    %cst_0 = arith.constant 1.000000e+00 : f32
    %0 = arith.addf %cst, %cst_0 : f32
    %cst_1 = arith.constant 0.000000e+00 : f32
    %1 = arith.subf %cst_1, %0 : f32
    %c0 = arith.constant 0 : index
    %2 = memref.load %arg1[%c0] : memref<1xf32, #tpu.memory_space<smem>>
    %cst_2 = arith.constant 1.270000e+02 : f32
    %3 = arith.divf %cst_2, %2 : f32
    %c0_3 = arith.constant 0 : index
    %c0_4 = arith.constant 0 : index
    %4 = vector.load %arg2[%c0_3, %c0_4] : memref<2x1024xf32, #tpu.memory_space<vmem>>, vector<2x1024xf32>
    %5 = vector.broadcast %3 : f32 to vector<2x1024xf32>
    %6 = arith.mulf %4, %5 : vector<2x1024xf32>
    %cst_5 = arith.constant 1.270000e+02 : f32
    %7 = vector.broadcast %1 : f32 to vector<2x1024xf32>
    %8 = arith.maximumf %7, %6 : vector<2x1024xf32>
    %9 = vector.broadcast %cst_5 : f32 to vector<2x1024xf32>
    %10 = arith.minimumf %9, %8 : vector<2x1024xf32>
    %11 = math.roundeven %10 : vector<2x1024xf32>
    %12 = vector.broadcast %3 : f32 to vector<2x1024xf32>
    %13 = arith.divf %11, %12 : vector<2x1024xf32>
    %c0_6 = arith.constant 0 : index
    %c0_7 = arith.constant 0 : index
    %14 = vector.load %arg3[%c0_6, %c0_7] : memref<2x1024xf32, #tpu.memory_space<vmem>>, vector<2x1024xf32>
    tpu.vector_store %arg3[%c0_6, %c0_7], %13 {strides = array<i32>} : memref<2x1024xf32, #tpu.memory_space<vmem>>, vector<2x1024xf32>,
    return
  }
  func.func @transform_0(%arg0: i32, %arg1: memref<1xf32, #tpu.memory_space<smem>>) -> (i32, i32) {
    %c0_i32 = arith.constant 0 : i32
    %c0_i32_0 = arith.constant 0 : i32
    return %arg0, %c0_i32 : i32, i32
  }
  func.func @transform_1(%arg0: i32, %arg1: memref<1xf32, #tpu.memory_space<smem>>) -> (i32, i32) {
    %c0_i32 = arith.constant 0 : i32
    %c0_i32_0 = arith.constant 0 : i32
    return %arg0, %c0_i32 : i32, i32
  }
}

</mosaic_0001>

<bundles_post_ra>
// kernel: tpu_custom_call.1
= control target key start
LH: loop header
LB: loop body
LE: loop exit
PB: predicated region body
PF: predicated region fallthrough
CT: control target
= control target key end

     0   :  { %8 = vsyncpa [#allocation5], 0  ;;  %s161_s0 = inlined_call_operand.<no memory space> [shape: f32[1], index: 0, kind: input, shape index: {}]   ;;  %s162_s1 = inlined_call_operand.hbm [shape: f32[2,1024], index: 1, kind: input, shape index: {}]   ;;  %s163_s2 = inlined_call_operand.hbm [shape: f32[2,1024], index: 2, kind: output, shape index: {}]  }
   0x1   :  { %9 = vsyncpa [#allocation6], 0  ;;  %s117_s9 = smov [#allocation4]   ;;  %s69_s13 = scalar_lea.hbm %s162_s1, 256 }
   0x2   :  { %s16_s10 = sshll.u32 %s117_s9, 4  ;;  %p70_p0 = scmp.ne.s32.totalorder %s162_s1, %s69_s13  ;;  %s17_s10 = int_to_ptr.vmem [resolvable:$true] %s16_s10 }
   0x3   :  { %p73_p1 = scmp.lt.u32.totalorder %s69_s13, %s162_s1 }
   0x5   :  { %p75_p2 = pnand %p73_p1, %p70_p0 }
   0x7   :  { %78 = shalt.err (!%p75_p2)
}
   0x8   :  { %s79_s18 = scalar_lea.vmem %s17_s10, 256  ;;  %p84_p4 = scmp.lt.s32.totalorder %s17_s10, %s17_s10 }
   0x9   :  { %p80_p3 = scmp.ne.s32.totalorder %s17_s10, %s79_s18  ;;  %p85_p5 = scmp.lt.s32.totalorder %s79_s18, %s79_s18 }
   0xb   :  { %p86_p6 = por %p85_p5, %p84_p4 }
   0xd   :  { %p87_p7 = pnand %p86_p6, %p80_p3 }
   0xf   :  { %90 = shalt.err (!%p87_p7)
}
  0x10   :  { %19 = dma.hbm_to_vmem [thread:$0]  %s162_s1, 256, %s17_s10, [#allocation5]   ;;  %v24_v0 = vstv %s161_s0 }
  0x11   :  { %113 = dma.done.wait [#allocation5], 256  }
  0x12   :  { %114 = vsyncadd [#allocation5], 4294967040  ;;  %65 = vrcp.f32 %v24_v0  ;;  %v28_v2 = vld [vmem:[#allocation4] sm:$0xff]  ;;  %v29_v3 = vld [vmem:[#allocation4 + $0x8] sm:$0xff]  ;;  %s118_s1 = smov [#allocation7]  }
  0x13   :  { %s50_s25 = sshll.u32 %s118_s1, 4  ;;  %s51_s25 = int_to_ptr.vmem [resolvable:$true] %s50_s25 }
  0x14   :  { %s91_s0 = scalar_lea.vmem %s51_s25, 256  ;;  %p96_p9 = scmp.lt.s32.totalorder %s51_s25, %s51_s25 }
  0x15   :  { %p92_p8 = scmp.ne.s32.totalorder %s51_s25, %s91_s0  ;;  %p97_p10 = scmp.lt.s32.totalorder %s91_s0, %s91_s0 }
  0x17   :  { %p98_p11 = por %p97_p10, %p96_p9 }
  0x19   :  { %p99_p12 = pnand %p98_p11, %p92_p8 }
  0x1c   :  { %v66_v1 = vpop.eup %65 }
  0x1d   :  { %59 = vpush %v66_v1 }
  0x4e   :  { %s60_s23 = spop %59 }
  0x4f   :  { %s27_s24 = smul.f32 127.0, %s60_s23 }
  0x51   :  { %v30_v4 = vstv %s27_s24 }
  0x52   :  { %v31_v5 = vmul.f32 %v30_v4, %v28_v2  ;;  %v32_v6 = vmul.f32 %v30_v4, %v29_v3  ;;  %67 = vrcp.f32 %v30_v4 }
  0x54   :  { %v33_v7 = vmax.f32 %v31_v5, -128.0  ;;  %v34_v8 = vmax.f32 %v32_v6, -128.0 }
  0x56   :  { %v35_v9 = vmin.f32 %v33_v7, 127.0  ;;  %v36_v10 = vmin.f32 %v34_v8, 127.0 }
  0x58   :  { %v61_v11 = vround.rtne.f32 %v35_v9  ;;  %v62_v12 = vround.rtne.f32 %v36_v10 }
  0x5c   :  { %v68_v13 = vpop.eup %67 }
  0x5d   :  { %v40_v14 = vmul.f32 %v68_v13, %v61_v11  ;;  %v41_v15 = vmul.f32 %v68_v13, %v62_v12 }
  0x5f   :  { %42 = vst [vmem:[#allocation7] sm:$0xff] %v40_v14  ;;  %43 = vst [vmem:[#allocation7 + $0x8] sm:$0xff] %v41_v15 }
  0x60   :  { %102 = shalt.err (!%p99_p12)
}
  0x61   :  { %s103_s28 = scalar_lea.hbm %s163_s2, 256 }
  0x62   :  { %p104_p13 = scmp.ne.s32.totalorder %s163_s2, %s103_s28  ;;  %p107_p0 = scmp.lt.u32.totalorder %s103_s28, %s163_s2 }
  0x64   :  { %p109_p1 = pnand %p107_p0, %p104_p13 }
  0x66   :  { %112 = shalt.err (!%p109_p1)
}
  0x67   :  { %53 = dma.vmem_to_hbm [thread:$0]  %s51_s25, 256, %s163_s2, [#allocation6]  }
  0x68   :  { %115 = dma.done.wait [#allocation6], 256  }
  0x69   :  { %116 = vsyncadd [#allocation6], 4294967040 }
  0x6a   :  { %57 = vsyncpa [#allocation5], 1 }
  0x6b   :  { %58 = vsyncpa [#allocation6], 1 }

</bundles_post_ra>
